<compile_context>
chip_gen: v5e
topology: v5e:2x2
jax: 0.10.0
libtpu: 0.0.40
codegen_flags: <defaults>
</compile_context>

<pallas_src>
import functools

import jax
import jax.numpy as jnp
from jax.experimental import pallas as pl
from jax.experimental.pallas import tpu as pltpu


def ffnn_kernel(x_ref, w1_ref, b1_ref, wh_ref, bh_ref, wl_ref, bl_ref, o_ref,
                *, num_hidden):
    """Whole TheNet forward for one (transposed) batch tile, resident in VMEM.

    x_ref : (D, bm)                  input tile, batch on lanes
    w1_ref: (W, D)    b1_ref: (W, 1)
    wh_ref: (num_hidden, W, W)   bh_ref: (num_hidden, W, 1)
    wl_ref: (W, 1)    bl_ref: (1, 1)
    o_ref : (1, bm)                  lane-dense output tile
    """
    # layer_first + ReLU
    u = jnp.dot(w1_ref[...], x_ref[...], preferred_element_type=jnp.float32)
    u = jnp.maximum(u + b1_ref[...], 0.0)

    # Hidden layers: fori_loop keeps vreg live ranges bounded even if
    # num_hidden grows; unroll=True still lets the scheduler see short trips.
    def hidden_layer(i, u):
        u = jnp.dot(wh_ref[i], u, preferred_element_type=jnp.float32)
        return jnp.maximum(u + bh_ref[i], 0.0)

    u = jax.lax.fori_loop(0, num_hidden, hidden_layer, u, unroll=True)

    # layer_last (width -> 1): VPU multiply + sublane reduce instead of a
    # 1-wide MXU matmul; the result is already lane-dense (1, bm).
    o_ref[...] = jnp.sum(u * wl_ref[...], axis=0, keepdims=True) + bl_ref[...]


def _round_up(n, m):
    return ((n + m - 1) // m) * m


_BM_MAX = 2048   # per review: sweep 1024/2048/4096; 2048 keeps <1.5 MiB/step


@functools.partial(jax.jit, static_argnames=("bm",))
def thenet_forward(x, params, *, bm=None):
    """TheNet forward. x: (B, D) float32 -> (B, 1) float32."""
    w1, b1, wh, bh, wl, bl = params
    B, D = x.shape
    W = w1.shape[0]
    num_hidden = wh.shape[0]

    # Batch tile selection: always lane-aligned (multiple of 128); at least
    # two tiles once the padded batch exceeds 128 so the parallel grid axis
    # can use the second TensorCore on v7x; capped at _BM_MAX.
    Bp = _round_up(B, 128)
    if bm is not None:
        bm = max(128, _round_up(bm, 128))
    elif Bp <= 128:
        bm = 128
    else:
        bm = max(128, min(_BM_MAX, ((Bp // 2) // 128) * 128))
    n_tiles = pl.cdiv(Bp, bm)
    Bp = n_tiles * bm

    # Transpose so batch is the lane (minor) axis; zero-pad to a tile multiple
    # (padded columns only produce relu(b) garbage that is sliced off).
    # Under jit these fold into the surrounding program (no extra HBM trips).
    x_t = x.T
    if Bp != B:
        x_t = jnp.pad(x_t, ((0, 0), (0, Bp - B)))

    flops = 2 * Bp * (D * W + num_hidden * W * W + W)
    bytes_accessed = 4 * (Bp * D + W * D + W + num_hidden * (W * W + W)
                          + W + 1 + Bp)
    cost = pl.CostEstimate(flops=flops, transcendentals=0,
                           bytes_accessed=bytes_accessed)

    kernel = functools.partial(ffnn_kernel, num_hidden=num_hidden)

    in_specs = [
        pl.BlockSpec((D, bm), lambda i: (0, i)),                  # x^T tile
        pl.BlockSpec((W, D), lambda i: (0, 0)),                   # W1
        pl.BlockSpec((W, 1), lambda i: (0, 0)),                   # b1
        pl.BlockSpec((num_hidden, W, W), lambda i: (0, 0, 0)),    # hidden Ws
        pl.BlockSpec((num_hidden, W, 1), lambda i: (0, 0, 0)),    # hidden bs
        pl.BlockSpec((W, 1), lambda i: (0, 0)),                   # W_last
        pl.BlockSpec((1, 1), lambda i: (0, 0)),                   # b_last
    ]

    out = pl.pallas_call(
        kernel,
        out_shape=jax.ShapeDtypeStruct((1, Bp), jnp.float32),
        grid=(n_tiles,),
        in_specs=in_specs,
        out_specs=pl.BlockSpec((1, bm), lambda i: (0, i)),  # lane-dense stores
        compiler_params=pltpu.CompilerParams(
            dimension_semantics=("parallel",)),
        cost_estimate=cost,
    )(x_t, w1, b1, wh, bh, wl, bl)

    # (1, Bp) lane-dense output -> (B, 1)
    return out[0, :B].reshape(B, 1)


def init_params(key, input_size, nn_width, num_hidden):
    """PyTorch nn.Linear-style init U(-1/sqrt(fan_in), 1/sqrt(fan_in)).
    Weights kept in (out, in) layout, biases as (out, 1) columns."""
    ks = jax.random.split(key, 6)

    def uniform(k, shape, fan_in):
        bound = 1.0 / jnp.sqrt(jnp.float32(fan_in))
        return jax.random.uniform(k, shape, jnp.float32, -bound, bound)

    w1 = uniform(ks[0], (nn_width, input_size), input_size)
    b1 = uniform(ks[1], (nn_width, 1), input_size)
    wh = uniform(ks[2], (num_hidden, nn_width, nn_width), nn_width)
    bh = uniform(ks[3], (num_hidden, nn_width, 1), nn_width)
    wl = uniform(ks[4], (nn_width, 1), nn_width)   # layer_last weight (transposed)
    bl = uniform(ks[5], (1, 1), nn_width)
    return w1, b1, wh, bh, wl, bl


def thenet_reference(x, params):
    """Pure-JAX reference of TheNet.forward (weights in (out, in) layout)."""
    w1, b1, wh, bh, wl, bl = params
    u = jnp.maximum(x @ w1.T + b1[:, 0], 0.0)
    for i in range(wh.shape[0]):
        u = jnp.maximum(u @ wh[i].T + bh[i, :, 0], 0.0)
    # layer_last written as an explicit weighted sum (identical math to
    # u @ wl + bl) so the reference shares exact f32 arithmetic with the
    # kernel's VPU reduce for the width->1 layer.
    return jnp.sum(u * wl[:, 0][None, :], axis=-1, keepdims=True) + bl[0, 0]


if __name__ == "__main__":
    input_size = 4
    nn_width = 32
    num_hidden = 2

    key = jax.random.PRNGKey(0)
    kx, kp = jax.random.split(key)
    params = init_params(kp, input_size, nn_width, num_hidden)

    # (batch, forced tile):
    #   batch=16  -> padded to one 128-lane tile (single grid step)
    #   batch=300 -> bm=128, 3 tiles: exercises multi-tile pipelining, batch
    #                padding, and the lane-dense (1, Bp) output layout.
    for batch, bm in ((16, None), (300, 128)):
        x = jax.random.normal(jax.random.fold_in(kx, batch),
                              (batch, input_size), jnp.float32)
        out = jax.block_until_ready(thenet_forward(x, params, bm=bm))
        ref = thenet_reference(x, params)
        assert out.shape == (batch, 1)
        assert jnp.allclose(out, ref, atol=1e-4, rtol=1e-4), \
            float(jnp.max(jnp.abs(out - ref)))

    print("KERNEL_OK")
</pallas_src>

<mosaic_0001>
module attributes {stable_mosaic.version = 11 : i64} {
  func.func @ffnn_kernel(%arg0: i32, %arg1: memref<4x128xf32, #tpu.memory_space<vmem>>, %arg2: memref<32x4xf32, #tpu.memory_space<vmem>>, %arg3: memref<32x1xf32, #tpu.memory_space<vmem>>, %arg4: memref<2x32x32xf32, #tpu.memory_space<vmem>>, %arg5: memref<2x32x1xf32, #tpu.memory_space<vmem>>, %arg6: memref<32x1xf32, #tpu.memory_space<vmem>>, %arg7: memref<1x1xf32, #tpu.memory_space<vmem>>, %arg8: memref<1x128xf32, #tpu.memory_space<vmem>>) attributes {dimension_semantics = [#tpu.dimension_semantics<parallel>], iteration_bounds = array<i64: 1>, scalar_prefetch = 0 : i64, scratch_operands = 0 : i64, tpu.core_type = #tpu.core_type<tc>, window_params = [{transform_indices = @transform_0, window_bounds = array<i64: 4, 128>}, {pipeline_mode = #tpu.pipeline_mode<synchronous>, transform_indices = @transform_1, window_bounds = array<i64: 32, 4>}, {pipeline_mode = #tpu.pipeline_mode<synchronous>, transform_indices = @transform_2, window_bounds = array<i64: 32, 1>}, {pipeline_mode = #tpu.pipeline_mode<synchronous>, transform_indices = @transform_3, window_bounds = array<i64: 2, 32, 32>}, {pipeline_mode = #tpu.pipeline_mode<synchronous>, transform_indices = @transform_4, window_bounds = array<i64: 2, 32, 1>}, {pipeline_mode = #tpu.pipeline_mode<synchronous>, transform_indices = @transform_5, window_bounds = array<i64: 32, 1>}, {pipeline_mode = #tpu.pipeline_mode<synchronous>, transform_indices = @transform_6, window_bounds = array<i64: 1, 1>}, {transform_indices = @transform_7, window_bounds = array<i64: 1, 128>}]} {
    %c0 = arith.constant 0 : index
    %c0_0 = arith.constant 0 : index
    %0 = vector.load %arg2[%c0, %c0_0] : memref<32x4xf32, #tpu.memory_space<vmem>>, vector<32x4xf32>
    %c0_1 = arith.constant 0 : index
    %c0_2 = arith.constant 0 : index
    %1 = vector.load %arg1[%c0_1, %c0_2] : memref<4x128xf32, #tpu.memory_space<vmem>>, vector<4x128xf32>
    %cst = arith.constant dense<0.000000e+00> : vector<32x128xf32>
    %2 = tpu.matmul %0, %1, %cst {dimension_numbers = #tpu.dot_dimension_numbers<[1], [0], [0], [1], [0, 0, 1, 1], [], []>} : vector<32x4xf32>, vector<4x128xf32>, vector<32x128xf32> -> vector<32x128xf32>
    %c0_3 = arith.constant 0 : index
    %c0_4 = arith.constant 0 : index
    %3 = vector.load %arg3[%c0_3, %c0_4] : memref<32x1xf32, #tpu.memory_space<vmem>>, vector<32x1xf32>
    %4 = vector.broadcast %3 : vector<32x1xf32> to vector<32x128xf32>
    %5 = arith.addf %2, %4 : vector<32x128xf32>
    %cst_5 = arith.constant 0.000000e+00 : f32
    %6 = vector.broadcast %cst_5 : f32 to vector<32x128xf32>
    %7 = arith.maximumf %5, %6 : vector<32x128xf32>
    %c0_i32 = arith.constant 0 : i32
    %8 = arith.index_cast %c0_i32 : i32 to index
    %c0_6 = arith.constant 0 : index
    %c0_7 = arith.constant 0 : index
    %9 = vector.load %arg4[%8, %c0_6, %c0_7] : memref<2x32x32xf32, #tpu.memory_space<vmem>>, vector<1x32x32xf32>
    %10 = vector.shape_cast %9 : vector<1x32x32xf32> to vector<32x32xf32>
    %cst_8 = arith.constant dense<0.000000e+00> : vector<32x128xf32>
    %11 = tpu.matmul %10, %7, %cst_8 {dimension_numbers = #tpu.dot_dimension_numbers<[1], [0], [0], [1], [0, 0, 1, 1], [], []>} : vector<32x32xf32>, vector<32x128xf32>, vector<32x128xf32> -> vector<32x128xf32>
    %12 = arith.index_cast %c0_i32 : i32 to index
    %c0_9 = arith.constant 0 : index
    %c0_10 = arith.constant 0 : index
    %13 = vector.load %arg5[%12, %c0_9, %c0_10] : memref<2x32x1xf32, #tpu.memory_space<vmem>>, vector<1x32x1xf32>
    %14 = vector.shape_cast %13 : vector<1x32x1xf32> to vector<32x1xf32>
    %15 = vector.broadcast %14 : vector<32x1xf32> to vector<32x128xf32>
    %16 = arith.addf %11, %15 : vector<32x128xf32>
    %cst_11 = arith.constant 0.000000e+00 : f32
    %17 = vector.broadcast %cst_11 : f32 to vector<32x128xf32>
    %18 = arith.maximumf %16, %17 : vector<32x128xf32>
    %c1_i32 = arith.constant 1 : i32
    %19 = arith.index_cast %c1_i32 : i32 to index
    %c0_12 = arith.constant 0 : index
    %c0_13 = arith.constant 0 : index
    %20 = vector.load %arg4[%19, %c0_12, %c0_13] : memref<2x32x32xf32, #tpu.memory_space<vmem>>, vector<1x32x32xf32>
    %21 = vector.shape_cast %20 : vector<1x32x32xf32> to vector<32x32xf32>
    %cst_14 = arith.constant dense<0.000000e+00> : vector<32x128xf32>
    %22 = tpu.matmul %21, %18, %cst_14 {dimension_numbers = #tpu.dot_dimension_numbers<[1], [0], [0], [1], [0, 0, 1, 1], [], []>} : vector<32x32xf32>, vector<32x128xf32>, vector<32x128xf32> -> vector<32x128xf32>
    %23 = arith.index_cast %c1_i32 : i32 to index
    %c0_15 = arith.constant 0 : index
    %c0_16 = arith.constant 0 : index
    %24 = vector.load %arg5[%23, %c0_15, %c0_16] : memref<2x32x1xf32, #tpu.memory_space<vmem>>, vector<1x32x1xf32>
    %25 = vector.shape_cast %24 : vector<1x32x1xf32> to vector<32x1xf32>
    %26 = vector.broadcast %25 : vector<32x1xf32> to vector<32x128xf32>
    %27 = arith.addf %22, %26 : vector<32x128xf32>
    %cst_17 = arith.constant 0.000000e+00 : f32
    %28 = vector.broadcast %cst_17 : f32 to vector<32x128xf32>
    %29 = arith.maximumf %27, %28 : vector<32x128xf32>
    %c2_i32 = arith.constant 2 : i32
    %c0_18 = arith.constant 0 : index
    %c0_19 = arith.constant 0 : index
    %30 = vector.load %arg6[%c0_18, %c0_19] : memref<32x1xf32, #tpu.memory_space<vmem>>, vector<32x1xf32>
    %31 = vector.broadcast %30 : vector<32x1xf32> to vector<32x128xf32>
    %32 = arith.mulf %29, %31 : vector<32x128xf32>
    %cst_20 = arith.constant dense<0.000000e+00> : vector<128xf32>
    %33 = vector.multi_reduction <add>, %32, %cst_20 [0] : vector<32x128xf32> to vector<128xf32>
    %34 = vector.shape_cast %33 : vector<128xf32> to vector<1x128xf32>
    %c0_21 = arith.constant 0 : index
    %c0_22 = arith.constant 0 : index
    %35 = vector.load %arg7[%c0_21, %c0_22] : memref<1x1xf32, #tpu.memory_space<vmem>>, vector<1x1xf32>
    %36 = vector.broadcast %35 : vector<1x1xf32> to vector<1x128xf32>
    %37 = arith.addf %34, %36 : vector<1x128xf32>
    %c0_23 = arith.constant 0 : index
    %c0_24 = arith.constant 0 : index
    %38 = vector.load %arg8[%c0_23, %c0_24] : memref<1x128xf32, #tpu.memory_space<vmem>>, vector<1x128xf32>
    tpu.vector_store %arg8[%c0_23, %c0_24], %37 {strides = array<i32>} : memref<1x128xf32, #tpu.memory_space<vmem>>, vector<1x128xf32>,
    return
  }
  func.func @transform_0(%arg0: i32) -> (i32, i32) {
    %c0_i32 = arith.constant 0 : i32
    %c0_i32_0 = arith.constant 0 : i32
    return %c0_i32, %arg0 : i32, i32
  }
  func.func @transform_1(%arg0: i32) -> (i32, i32) {
    %c0_i32 = arith.constant 0 : i32
    %c0_i32_0 = arith.constant 0 : i32
    %c0_i32_1 = arith.constant 0 : i32
    return %c0_i32, %c0_i32_0 : i32, i32
  }
  func.func @transform_2(%arg0: i32) -> (i32, i32) {
    %c0_i32 = arith.constant 0 : i32
    %c0_i32_0 = arith.constant 0 : i32
    %c0_i32_1 = arith.constant 0 : i32
    return %c0_i32, %c0_i32_0 : i32, i32
  }
  func.func @transform_3(%arg0: i32) -> (i32, i32, i32) {
    %c0_i32 = arith.constant 0 : i32
    %c0_i32_0 = arith.constant 0 : i32
    %c0_i32_1 = arith.constant 0 : i32
    %c0_i32_2 = arith.constant 0 : i32
    return %c0_i32, %c0_i32_0, %c0_i32_1 : i32, i32, i32
  }
  func.func @transform_4(%arg0: i32) -> (i32, i32, i32) {
    %c0_i32 = arith.constant 0 : i32
    %c0_i32_0 = arith.constant 0 : i32
    %c0_i32_1 = arith.constant 0 : i32
    %c0_i32_2 = arith.constant 0 : i32
    return %c0_i32, %c0_i32_0, %c0_i32_1 : i32, i32, i32
  }
  func.func @transform_5(%arg0: i32) -> (i32, i32) {
    %c0_i32 = arith.constant 0 : i32
    %c0_i32_0 = arith.constant 0 : i32
    %c0_i32_1 = arith.constant 0 : i32
    return %c0_i32, %c0_i32_0 : i32, i32
  }
  func.func @transform_6(%arg0: i32) -> (i32, i32) {
    %c0_i32 = arith.constant 0 : i32
    %c0_i32_0 = arith.constant 0 : i32
    %c0_i32_1 = arith.constant 0 : i32
    return %c0_i32, %c0_i32_0 : i32, i32
  }
  func.func @transform_7(%arg0: i32) -> (i32, i32) {
    %c0_i32 = arith.constant 0 : i32
    %c0_i32_0 = arith.constant 0 : i32
    return %c0_i32, %arg0 : i32, i32
  }
}

</mosaic_0001>

<bundles_post_ra>
// kernel: thenet_forward.1
= control target key start
LH: loop header
LB: loop body
LE: loop exit
PB: predicated region body
PF: predicated region fallthrough
CT: control target
= control target key end

     0   :  { %vm70_vm0 = vcmask 1043456   ;;  %v339_v0 = vmov 0   ;;  %vm57_vm1 = vcmask 31744   ;;  %vm135_vm2 = vcmask 261120   ;;  %s485_s2 = inlined_call_operand.vmem [shape: f32[32,1], index: 2, kind: input, shape index: {}]   ;;  %s486_s0 = inlined_call_operand.vmem [shape: f32[4,128], index: 0, kind: input, shape index: {}]   ;;  %s487_s1 = inlined_call_operand.vmem [shape: f32[32,4], index: 1, kind: input, shape index: {}]   ;;  %s488_s6 = inlined_call_operand.<no memory space> [shape: f32[1,1], index: 6, kind: input, shape index: {}]   ;;  %s489_s4 = inlined_call_operand.vmem [shape: f32[2,32,1], index: 4, kind: input, shape index: {}]   ;;  %s490_s5 = inlined_call_operand.vmem [shape: f32[32,1], index: 5, kind: input, shape index: {}]   ;;  %s491_s3 = inlined_call_operand.vmem [shape: f32[2,32,32], index: 3, kind: input, shape index: {}]   ;;  %s492_s7 = inlined_call_operand.vmem [shape: f32[1,128], index: 7, kind: output, shape index: {}]  }
   0x1   :  { %337 = vset.pattern.permute.xlu1 %v339_v0  ;;  %336 = vset.pattern.permute.xlu0 %v339_v0  ;;  %v36_v1 = vld [vmem:[%s485_s2 + $0x18] sm:$0xff]  ;;  %v34_v2 = vld [vmem:[%s485_s2 + $0x8] sm:$0xff]  ;;  %v32_v3 = vld [vmem:[%s486_s0] sm:$0xf]  ;;  %v12_v5 = vstv %s488_s6 }
   0x2   :  { %54 = vperm.xlu0 %336, %v36_v1   ;;  %44 = vperm.xlu1 %337, %v34_v2   ;;  %v28_v4 = vld [vmem:[%s487_s1] sm:$0xff]  ;;  %13 = vst [vmem:[#allocation2] sm:$0x1] %v12_v5  ;;  %v35_v6 = vld [vmem:[%s485_s2 + $0x10] sm:$0xff]  ;;  %v29_v8 = vld [vmem:[%s487_s1 + $0x8] sm:$0xff] }
   0x3   :  { %306 = vmatpush.msk.msra.mxu0 %vm70_vm0, %v32_v3  ;;  %338 = vset.pattern.permute.xlu2 %v339_v0  ;;  %v33_v7 = vld [vmem:[%s485_s2] sm:$0xff]  ;;  %v112_v9 = vld [vmem:[%s489_s4 + $0x8] sm:$0xff]  ;;  %v30_v11 = vld [vmem:[%s487_s1 + $0x10] sm:$0xff] }
   0x4   :  { %307 = vmatmul.msk.f32.vlgmr.msra.gmra.mxu0 %vm57_vm1, %v28_v4  ;;  %v111_v10 = vld [vmem:[%s489_s4] sm:$0xff]  ;;  %v320_v12 = vld [vmem:[%s489_s4 + $0x28] sm:$0xff]  ;;  %v321_v13 = vld [vmem:[%s489_s4 + $0x30] sm:$0xff] }
   0x5   :  { %v31_v14 = vld [vmem:[%s487_s1 + $0x18] sm:$0xff]  ;;  %v256_v15 = vld [vmem:[%s490_s5] sm:$0xff]  ;;  %v257_v16 = vld [vmem:[%s490_s5 + $0x8] sm:$0xff] }
   0x6   :  { %v259_v17 = vld [vmem:[%s490_s5 + $0x18] sm:$0xff]  ;;  %v113_v31 = vld [vmem:[%s489_s4 + $0x10] sm:$0xff]  ;;  %v107_v37 = vld [vmem:[%s491_s3] sm:$0xff] }
   0x7   :  { %v114_v24 = vld [vmem:[%s489_s4 + $0x18] sm:$0xff]  ;;  %v108_v38 = vld [vmem:[%s491_s3 + $0x8] sm:$0xff]  ;;  %v319_v39 = vld [vmem:[%s489_s4 + $0x20] sm:$0xff] }
   0x8   :  { %132 = vperm.xlu2 %338, %v114_v24   ;;  %v109_v40 = vld [vmem:[%s491_s3 + $0x10] sm:$0xff]  ;;  %v322_v41 = vld [vmem:[%s489_s4 + $0x38] sm:$0xff]  ;;  %v315_v60 = vld [vmem:[%s491_s3 + $0x20] sm:$0xff] }
   0x9   :  { %v293_v18 = vld [vmem:[#allocation2] sm:$0x1]  ;;  %v110_v42 = vld [vmem:[%s491_s3 + $0x18] sm:$0xff]  ;;  %v258_v43 = vld [vmem:[%s490_s5 + $0x10] sm:$0xff] }
   0xa   :  { %49 = vperm.xlu0 %336, %v35_v6   ;;  %39 = vperm.xlu1 %337, %v33_v7   ;;  %v316_v61 = vld [vmem:[%s491_s3 + $0x28] sm:$0xff]  ;;  %v317_v62 = vld [vmem:[%s491_s3 + $0x30] sm:$0xff]  ;;  %v318_v63 = vld [vmem:[%s491_s3 + $0x38] sm:$0xff] }
   0xc   :  { %308 = vmatmul.msk.f32.gmra.mxu0 %vm57_vm1, %v29_v8 }
  0x10   :  { %127 = vperm.xlu2 %338, %v113_v31  }
  0x12   :  { %122 = vperm.xlu0 %336, %v112_v9   ;;  %117 = vperm.xlu1 %337, %v111_v10  }
  0x14   :  { %309 = vmatmul.msk.f32.gmra.mxu0 %vm57_vm1, %v30_v11 }
  0x18   :  { %193 = vperm.xlu2 %338, %v319_v39  }
  0x1a   :  { %198 = vperm.xlu0 %336, %v320_v12   ;;  %203 = vperm.xlu1 %337, %v321_v13  }
  0x1c   :  { %310 = vmatmul.msk.f32.gmra.mxu0 %vm57_vm1, %v31_v14 }
  0x20   :  { %208 = vperm.xlu2 %338, %v322_v41  }
  0x22   :  { %262 = vperm.xlu0 %336, %v256_v15   ;;  %267 = vperm.xlu1 %337, %v257_v16  }
  0x28   :  { %272 = vperm.xlu2 %338, %v258_v43  }
  0x2a   :  { %277 = vperm.xlu0 %336, %v259_v17   ;;  %296 = vperm.xlu1 %337, %v293_v18  }
  0x62   :  { %v133_v45 = vpop.permute.xlu2 %132 }
  0x6a   :  { %v128_v47 = vpop.permute.xlu2 %127 }
  0x72   :  { %v194_v0 = vpop.permute.xlu2 %193 }
  0x74   :  { %v55_v21 = vpop.permute.xlu0 %54  ;;  %v45_v23 = vpop.permute.xlu1 %44 }
  0x7a   :  { %v209_v4 = vpop.permute.xlu2 %208 }
  0x7c   :  { %v50_v25 = vpop.permute.xlu0 %49  ;;  %v40_v32 = vpop.permute.xlu1 %39 }
  0x81   :  { %v91_v19 = vpop.f32.mrf.mxu0 }
  0x82   :  { %v92_v33 = vadd.f32 %v91_v19, %v40_v32  ;;  %v273_v16 = vpop.permute.xlu2 %272 }
  0x84   :  { %v103_v36 = vmax.f32 %v92_v33, 0.0  ;;  %v123_v51 = vpop.permute.xlu0 %122  ;;  %v118_v55 = vpop.permute.xlu1 %117 }
  0x89   :  { %v94_v20 = vpop.f32.mrf.mxu0 }
  0x8a   :  { %v95_v29 = vadd.f32 %v94_v20, %v45_v23 }
  0x8c   :  { %v104_v35 = vmax.f32 %v95_v29, 0.0  ;;  %v199_v1 = vpop.permute.xlu0 %198  ;;  %v204_v3 = vpop.permute.xlu1 %203 }
  0x91   :  { %v97_v22 = vpop.f32.mrf.mxu0 }
  0x92   :  { %v98_v27 = vadd.f32 %v97_v22, %v50_v25 }
  0x94   :  { %v105_v34 = vmax.f32 %v98_v27, 0.0  ;;  %v263_v10 = vpop.permute.xlu0 %262  ;;  %v268_v14 = vpop.permute.xlu1 %267 }
  0x99   :  { %v100_v26 = vpop.f32.mrf.mxu0 }
  0x9a   :  { %v101_v28 = vadd.f32 %v100_v26, %v55_v21 }
  0x9c   :  { %v106_v30 = vmax.f32 %v101_v28, 0.0  ;;  %v278_v23 = vpop.permute.xlu0 %277  ;;  %v297_v31 = vpop.permute.xlu1 %296 }
  0x9d   :  { %v299_v33 = vperm.slane %v297_v31, 0 }
  0x9e   :  { %160 = vmatpush.msra.mxu1 %v106_v30  ;;  %327 = vmatpush.msra.mxu3 %v106_v30 }
  0xa0   :  { %161 = vmatpush.msra.mxu1 %v105_v34  ;;  %328 = vmatpush.msra.mxu3 %v105_v34 }
  0xa2   :  { %162 = vmatpush.msra.mxu1 %v104_v35  ;;  %329 = vmatpush.msra.mxu3 %v104_v35 }
  0xa4   :  { %163 = vmatpush.msra.mxu1 %v103_v36  ;;  %330 = vmatpush.msra.mxu3 %v103_v36 }
  0xa5   :  { %311 = vmatmul.msk.f32.vlgmr.msra.gmra.mxu1 %vm135_vm2, %v107_v37  ;;  %312 = vmatmul.msk.f32.vlgmr.msra.gmra.mxu3 %vm135_vm2, %v108_v38 }
  0xad   :  { %313 = vmatmul.msk.f32.gmra.mxu3 %vm135_vm2, %v109_v40 }
  0xb5   :  { %314 = vmatmul.msk.f32.gmra.mxu3 %vm135_vm2, %v110_v42 }
 0x122   :  { %v165_v52 = vpop.f32.mrf.mxu1 }
 0x123   :  { %v166_v56 = vadd.f32 %v165_v52, %v118_v55 }
 0x125   :  { %v177_v59 = vmax.f32 %v166_v56, 0.0 }
 0x128   :  { %v168_v44 = vpop.f32.mrf.mxu3 }
 0x129   :  { %v169_v53 = vadd.f32 %v168_v44, %v123_v51 }
 0x12b   :  { %v178_v58 = vmax.f32 %v169_v53, 0.0 }
 0x130   :  { %v171_v46 = vpop.f32.mrf.mxu3 }
 0x131   :  { %v172_v49 = vadd.f32 %v171_v46, %v128_v47 }
 0x133   :  { %v179_v57 = vmax.f32 %v172_v49, 0.0 }
 0x138   :  { %v174_v48 = vpop.f32.mrf.mxu3 }
 0x139   :  { %v175_v50 = vadd.f32 %v174_v48, %v133_v45 }
 0x13b   :  { %v180_v54 = vmax.f32 %v175_v50, 0.0 }
 0x13d   :  { %235 = vmatpush.msrb.mxu1 %v180_v54  ;;  %331 = vmatpush.msra.mxu2 %v180_v54 }
 0x13f   :  { %236 = vmatpush.msrb.mxu1 %v179_v57  ;;  %332 = vmatpush.msra.mxu2 %v179_v57 }
 0x141   :  { %237 = vmatpush.msrb.mxu1 %v178_v58  ;;  %333 = vmatpush.msra.mxu2 %v178_v58 }
 0x143   :  { %238 = vmatpush.msrb.mxu1 %v177_v59  ;;  %334 = vmatpush.msra.mxu2 %v177_v59 }
 0x144   :  { %323 = vmatmul.msk.f32.vlgmr.msrb.gmra.mxu1 %vm135_vm2, %v315_v60  ;;  %324 = vmatmul.msk.f32.vlgmr.msra.gmra.mxu2 %vm135_vm2, %v316_v61 }
 0x14c   :  { %325 = vmatmul.msk.f32.gmra.mxu2 %vm135_vm2, %v317_v62 }
 0x154   :  { %326 = vmatmul.msk.f32.gmra.mxu2 %vm135_vm2, %v318_v63 }
 0x1c1   :  { %v240_v5 = vpop.f32.mrf.mxu1 }
 0x1c2   :  { %v241_v8 = vadd.f32 %v240_v5, %v194_v0 }
 0x1c4   :  { %v252_v12 = vmax.f32 %v241_v8, 0.0 }
 0x1c6   :  { %v280_v18 = vmul.f32 %v263_v10, %v252_v12 }
 0x1c7   :  { %v243_v2 = vpop.f32.mrf.mxu2 }
 0x1c8   :  { %v244_v6 = vadd.f32 %v243_v2, %v199_v1 }
 0x1ca   :  { %v253_v11 = vmax.f32 %v244_v6, 0.0 }
 0x1cc   :  { %v281_v15 = vmul.f32 %v268_v14, %v253_v11 }
 0x1ce   :  { %v284_v21 = vadd.f32 %v281_v15, %v280_v18 }
 0x1cf   :  { %v246_v7 = vpop.f32.mrf.mxu2 }
 0x1d0   :  { %v247_v9 = vadd.f32 %v246_v7, %v204_v3 }
 0x1d2   :  { %v254_v13 = vmax.f32 %v247_v9, 0.0 }
 0x1d4   :  { %v282_v19 = vmul.f32 %v273_v16, %v254_v13 }
 0x1d6   :  { %v285_v24 = vadd.f32 %v284_v21, %v282_v19 }
 0x1d7   :  { %v249_v17 = vpop.f32.mrf.mxu2 }
 0x1d8   :  { %v250_v20 = vadd.f32 %v249_v17, %v209_v4 }
 0x1da   :  { %v255_v22 = vmax.f32 %v250_v20, 0.0 }
 0x1dc   :  { %v283_v25 = vmul.f32 %v278_v23, %v255_v22 }
 0x1de   :  { %v286_v26 = vadd.f32 %v285_v24, %v283_v25 }
 0x1e0   :  { %v287_v27 = vrot.slane %v286_v26, 4 }
 0x1e2   :  { %v288_v28 = vadd.f32 %v287_v27, %v286_v26 }
 0x1e4   :  { %v289_v29 = vrot.slane %v288_v28, 2 }
 0x1e6   :  { %v290_v30 = vadd.f32 %v289_v29, %v288_v28 }
 0x1e8   :  { %v291_v32 = vrot.slane %v290_v30, 1 }
 0x1ea   :  { %v292_v34 = vadd.f32 %v291_v32, %v290_v30 }
 0x1ec   :  { %v300_v35 = vadd.f32 %v299_v33, %v292_v34 }
 0x1ee   :  { %301 = vst [vmem:[%s492_s7] sm:$0x1] %v300_v35 }

</bundles_post_ra>
